<compile_context>
chip_gen: v7x
topology: tpu7x:2x2x1
jax: 0.10.0
libtpu: 0.0.40
codegen_flags: <defaults>
</compile_context>

<pallas_src>
import jax
import jax.numpy as jnp
from jax import lax
from jax.experimental import pallas as pl
from jax.experimental.pallas import tpu as pltpu


def _round_up(a: int, m: int) -> int:
    return ((a + m - 1) // m) * m


def _make_kernel(hw_total: int, thw: int, cw: int, needs_mask: bool):
    inv_hw = 1.0 / float(hw_total)
    nchunks = thw // cw  # exact: either cw == 128 and thw % 128 == 0, or cw == thw

    def kernel(x_ref, w1t_ref, w2t_ref, o_ref, sum_acc, max_acc):
        # x_ref:   (Bb, C, THW)  slice of the flattened (B, C, H*W) input
        # w1t_ref: (C, Chp)      fc1 weight, transposed, hidden dim zero-padded
        # w2t_ref: (Chp, C)      fc2 weight, transposed, hidden dim zero-padded
        # o_ref:   (Bb, C)       sigmoid(channel attention) for this batch block
        # sum_acc: (Bb, C, cw)   lane-partial running spatial sum (f32)
        # max_acc: (Bb, C, cw)   lane-partial running spatial max (f32)
        k = pl.program_id(1)

        @pl.when(k == 0)
        def _init():
            sum_acc[...] = jnp.zeros(sum_acc.shape, sum_acc.dtype)
            max_acc[...] = jnp.full(max_acc.shape, -jnp.inf, max_acc.dtype)

        # Steady state: pure element-wise VPU work over 128-lane chunks sliced
        # straight off the ref.  No full-tile f32 temp, no per-step cross-lane
        # reduce -> the loop hides under the x DMA on all generations.
        @pl.loop(0, nchunks)
        def _chunk(j):
            off = pl.multiple_of(j * cw, cw)
            xc = x_ref[:, :, pl.ds(off, cw)].astype(jnp.float32)   # (Bb, C, cw)
            if needs_mask:
                # Tail lanes past the real H*W contribute 0 to the sum and
                # -inf (identity) to the max.
                lane = lax.broadcasted_iota(jnp.int32, (1, 1, cw), 2)
                valid = (k * thw + j * cw + lane) < hw_total
                xs = jnp.where(valid, xc, 0.0)
                xm = jnp.where(valid, xc, -jnp.inf)
            else:
                xs = xc
                xm = xc
            sum_acc[...] += xs
            max_acc[...] = jnp.maximum(max_acc[...], xm)

        @pl.when(k == pl.num_programs(1) - 1)
        def _finalize():
            # One cross-lane reduce (+ C -> lane relayout) per batch block.
            avg = jnp.sum(sum_acc[...], axis=-1) * inv_hw            # (Bb, C)
            mx = jnp.max(max_acc[...], axis=-1)                      # (Bb, C)
            w1t = w1t_ref[...]                                       # (C, Chp)
            # fc2 is linear: fc2(relu(fc1(avg))) + fc2(relu(fc1(mx)))
            #              == fc2(relu(fc1(avg)) + relu(fc1(mx)))  -> 3 matmuls.
            h = (jnp.maximum(jnp.dot(avg, w1t,
                                     preferred_element_type=jnp.float32), 0.0)
                 + jnp.maximum(jnp.dot(mx, w1t,
                                       preferred_element_type=jnp.float32), 0.0))
            y = jnp.dot(h, w2t_ref[...],
                        preferred_element_type=jnp.float32)          # (Bb, C)
            o_ref[...] = jax.nn.sigmoid(y).astype(o_ref.dtype)

    return kernel


def _pick_batch_block(B: int) -> int:
    # The (Bb, C) output block requires Bb % 8 == 0 or Bb == B.  Bb = 8 bounds
    # the VMEM footprint and, for B >= 16, gives grid[0] >= 2 so the "parallel"
    # batch axis can shard across v7x's two TensorCores.  For B < 16 only one
    # TC runs; a core-parallel split of the HW reduction is not worth the extra
    # combine pass for this memory-bound kernel.
    return 8 if (B % 8 == 0) else B


def _vmem_budgets():
    """Generation-aware budgets: (x-block budget bytes, vmem_limit_bytes)."""
    cap = None
    try:
        cap = int(pltpu.get_tpu_info().vmem_capacity_bytes)
    except Exception:
        cap = None
    if cap is not None and cap >= 100 * 1024 * 1024:
        # v5e / v6e: 128 MiB physical VMEM -> bigger tiles, fewer grid steps,
        # longer contiguous DMA segments (the only lever that matters at
        # ~0.8-1.4 TB/s HBM).
        return 48 * 1024 * 1024, 96 * 1024 * 1024
    # v7x (64 MiB physical VMEM) or unknown backend: stay conservative.
    return 20 * 1024 * 1024, 48 * 1024 * 1024


def _pick_hw_tile(HW: int, C: int, Bb: int, itemsize: int, x_budget: int) -> int:
    """Largest multiple-of-128 spatial tile whose double-buffered x block fits
    `x_budget`.  THW need not divide HW (tail lanes are masked in-kernel)."""
    if HW < 128:
        return HW                              # block must equal the full dim
    hw128 = (HW // 128) * 128                  # keep THW <= HW
    max_thw = x_budget // (2 * Bb * C * itemsize)
    max_thw = max(128, (max_thw // 128) * 128)
    return int(min(hw128, max_thw))


def channel_attention(x, w1, w2):
    """x: (B, C, H, W) NCHW.  w1: (C//16, C, 1, 1), w2: (C, C//16, 1, 1).
    Returns sigmoid channel attention of shape (B, C, 1, 1), matching PyTorch."""
    B, C, H, W = x.shape
    Ch = w1.shape[0]
    HW = H * W
    itemsize = jnp.dtype(x.dtype).itemsize
    wsize = jnp.dtype(w1.dtype).itemsize

    Bb = _pick_batch_block(B)

    # 1x1 convs == matmuls; zero-pad the tiny hidden dim (C // 16) to a
    # lane-friendly width (exact: relu(0) = 0 contributes nothing).  No padding
    # beyond 128/next multiple -- the MLP is off the critical path.
    Chp = max(128, _round_up(Ch, 128))

    x_budget, vmem_limit = _vmem_budgets()
    # Reserve VMEM for the lane-partial accumulators, the resident (double-
    # buffered) weights and the output block before sizing the x tile.
    cw_guess = 128 if HW >= 128 else HW
    overhead = (2 * Bb * C * cw_guess * 4          # two f32 accumulators
                + 2 * 2 * C * Chp * wsize          # w1t + w2t, double-buffered
                + 2 * Bb * C * itemsize)           # output block
    x_budget = max(x_budget - overhead, 2 * Bb * C * 128 * itemsize)

    THW = _pick_hw_tile(HW, C, Bb, itemsize, x_budget)
    cw = 128 if THW >= 128 else THW
    grid_k = pl.cdiv(HW, THW)
    needs_mask = (grid_k * THW != HW)

    x_flat = x.reshape(B, C, HW)

    w1m = w1.reshape(Ch, C)
    w2m = w2.reshape(C, Ch)
    w1t = jnp.zeros((C, Chp), w1.dtype).at[:, :Ch].set(w1m.T)   # (C, Chp)
    w2t = jnp.zeros((Chp, C), w2.dtype).at[:Ch, :].set(w2m.T)   # (Chp, C)

    grid = (B // Bb, grid_k)

    cost = pl.CostEstimate(
        flops=int(2 * B * C * HW + 6 * B * C * Chp),
        transcendentals=int(2 * B * C),
        bytes_accessed=int(x_flat.size * itemsize
                           + (w1t.size + w2t.size) * wsize
                           + B * C * itemsize),
    )

    out = pl.pallas_call(
        _make_kernel(HW, THW, cw, needs_mask),
        out_shape=jax.ShapeDtypeStruct((B, C), x.dtype),
        grid_spec=pltpu.PrefetchScalarGridSpec(
            num_scalar_prefetch=0,
            grid=grid,
            in_specs=[
                pl.BlockSpec((Bb, C, THW), lambda b, k: (b, 0, k)),
                # Resident weights (constant index_map).  They are tiny next to
                # the x tile, so default double-buffering is negligible here;
                # switch to pl.Buffered(1) only if C grows large enough for the
                # duplicate weight copies to eat into the x-tile budget.
                pl.BlockSpec((C, Chp), lambda b, k: (0, 0)),
                pl.BlockSpec((Chp, C), lambda b, k: (0, 0)),
            ],
            out_specs=pl.BlockSpec((Bb, C), lambda b, k: (b, 0)),
            scratch_shapes=[
                pltpu.VMEM((Bb, C, cw), jnp.float32),   # lane-partial sum
                pltpu.VMEM((Bb, C, cw), jnp.float32),   # lane-partial max
            ],
        ),
        compiler_params=pltpu.CompilerParams(
            dimension_semantics=("parallel", "arbitrary"),
            vmem_limit_bytes=vmem_limit,
        ),
        cost_estimate=cost,
    )(x_flat, w1t, w2t)

    return out.reshape(B, C, 1, 1)


def channel_attention_ref(x, w1, w2):
    """Pure-JAX reference mirroring the PyTorch forward."""
    B, C, H, W = x.shape
    Ch = w1.shape[0]
    avg = jnp.mean(x, axis=(2, 3))                       # (B, C)
    mx = jnp.max(x, axis=(2, 3))                         # (B, C)
    w1m = w1.reshape(Ch, C)
    w2m = w2.reshape(C, Ch)

    def mlp(v):
        h = jnp.maximum(v @ w1m.T, 0.0)
        return h @ w2m.T

    out = jax.nn.sigmoid(mlp(avg) + mlp(mx))             # (B, C)
    return out.reshape(B, C, 1, 1)


if __name__ == "__main__":
    B, C, H, W = 2, 32, 16, 16      # in_planes=32 -> hidden = 32 // 16 = 2
    Ch = C // 16

    key = jax.random.PRNGKey(0)
    kx, k1, k2 = jax.random.split(key, 3)
    x = jax.random.normal(kx, (B, C, H, W), dtype=jnp.float32)
    # Deterministic 1x1-conv weights (no bias), kaiming-ish scale.
    w1 = jax.random.normal(k1, (Ch, C, 1, 1), dtype=jnp.float32) * (2.0 / C) ** 0.5
    w2 = jax.random.normal(k2, (C, Ch, 1, 1), dtype=jnp.float32) * (2.0 / Ch) ** 0.5

    out = channel_attention(x, w1, w2)
    out = jax.block_until_ready(out)

    ref = channel_attention_ref(x, w1, w2)
    assert out.shape == (B, C, 1, 1)
    assert jnp.allclose(out, ref, atol=1e-5, rtol=1e-5)

    print("KERNEL_OK")
</pallas_src>

<mosaic_0001>
module attributes {stable_mosaic.version = 11 : i64} {
  func.func @kernel(%arg0: i32, %arg1: i32, %arg2: memref<2x32x256xf32, #tpu.memory_space<vmem>>, %arg3: memref<32x128xf32, #tpu.memory_space<vmem>>, %arg4: memref<128x32xf32, #tpu.memory_space<vmem>>, %arg5: memref<2x32xf32, #tpu.memory_space<vmem>>, %arg6: memref<2x32x128xf32, #tpu.memory_space<vmem>>, %arg7: memref<2x32x128xf32, #tpu.memory_space<vmem>>) attributes {dimension_semantics = [#tpu.dimension_semantics<parallel>, #tpu.dimension_semantics<arbitrary>], iteration_bounds = array<i64: 1, 1>, scalar_prefetch = 0 : i64, scratch_operands = 2 : i64, tpu.core_type = #tpu.core_type<tc>, window_params = [{transform_indices = @transform_0, window_bounds = array<i64: 2, 32, 256>}, {pipeline_mode = #tpu.pipeline_mode<synchronous>, transform_indices = @transform_1, window_bounds = array<i64: 32, 128>}, {pipeline_mode = #tpu.pipeline_mode<synchronous>, transform_indices = @transform_2, window_bounds = array<i64: 128, 32>}, {transform_indices = @transform_3, window_bounds = array<i64: 2, 32>}]} {
    %c0_i32 = arith.constant 0 : i32
    %0 = arith.cmpi eq, %arg1, %c0_i32 : i32
    %1 = arith.extui %0 : i1 to i32
    %c0_i32_0 = arith.constant 0 : i32
    %2 = arith.cmpi ne, %1, %c0_i32_0 : i32
    scf.if %2 {
      %cst = arith.constant 0.000000e+00 : f32
      %7 = vector.broadcast %cst : f32 to vector<2x32x128xf32>
      %c0 = arith.constant 0 : index
      %c0_5 = arith.constant 0 : index
      %c0_6 = arith.constant 0 : index
      %8 = vector.load %arg6[%c0, %c0_5, %c0_6] : memref<2x32x128xf32, #tpu.memory_space<vmem>>, vector<2x32x128xf32>
      tpu.vector_store %arg6[%c0, %c0_5, %c0_6], %7 {strides = array<i32>} : memref<2x32x128xf32, #tpu.memory_space<vmem>>, vector<2x32x128xf32>,
      %cst_7 = arith.constant 0xFF800000 : f32
      %9 = vector.broadcast %cst_7 : f32 to vector<2x32x128xf32>
      %c0_8 = arith.constant 0 : index
      %c0_9 = arith.constant 0 : index
      %c0_10 = arith.constant 0 : index
      %10 = vector.load %arg7[%c0_8, %c0_9, %c0_10] : memref<2x32x128xf32, #tpu.memory_space<vmem>>, vector<2x32x128xf32>
      tpu.vector_store %arg7[%c0_8, %c0_9, %c0_10], %9 {strides = array<i32>} : memref<2x32x128xf32, #tpu.memory_space<vmem>>, vector<2x32x128xf32>,
    } else {
    }
    %c0_i32_1 = arith.constant 0 : i32
    %c2_i32 = arith.constant 2 : i32
    %3 = arith.addi %c0_i32_1, %c2_i32 : i32
    %c1_i32 = arith.constant 1 : i32
    scf.for %arg8 = %c0_i32_1 to %3 step %c1_i32  : i32 {
      %c1_i32_5 = arith.constant 1 : i32
      %7 = arith.muli %arg8, %c1_i32_5 : i32
      %c0_i32_6 = arith.constant 0 : i32
      %8 = arith.addi %c0_i32_6, %7 : i32
      %c128_i32 = arith.constant 128 : i32
      %9 = arith.muli %8, %c128_i32 : i32
      %10 = tpu.assume_multiple %9, 128 : i32
      %c0 = arith.constant 0 : index
      %c0_7 = arith.constant 0 : index
      %11 = arith.index_cast %10 : i32 to index
      %12 = vector.load %arg2[%c0, %c0_7, %11] : memref<2x32x256xf32, #tpu.memory_space<vmem>>, vector<2x32x128xf32>
      %c0_8 = arith.constant 0 : index
      %c0_9 = arith.constant 0 : index
      %c0_10 = arith.constant 0 : index
      %13 = vector.load %arg6[%c0_8, %c0_9, %c0_10] : memref<2x32x128xf32, #tpu.memory_space<vmem>>, vector<2x32x128xf32>
      %14 = arith.addf %13, %12 : vector<2x32x128xf32>
      %c0_11 = arith.constant 0 : index
      %c0_12 = arith.constant 0 : index
      %c0_13 = arith.constant 0 : index
      %15 = vector.load %arg6[%c0_11, %c0_12, %c0_13] : memref<2x32x128xf32, #tpu.memory_space<vmem>>, vector<2x32x128xf32>
      tpu.vector_store %arg6[%c0_11, %c0_12, %c0_13], %14 {strides = array<i32>} : memref<2x32x128xf32, #tpu.memory_space<vmem>>, vector<2x32x128xf32>,
      %c0_14 = arith.constant 0 : index
      %c0_15 = arith.constant 0 : index
      %c0_16 = arith.constant 0 : index
      %16 = vector.load %arg7[%c0_14, %c0_15, %c0_16] : memref<2x32x128xf32, #tpu.memory_space<vmem>>, vector<2x32x128xf32>
      %17 = arith.maximumf %16, %12 : vector<2x32x128xf32>
      %c0_17 = arith.constant 0 : index
      %c0_18 = arith.constant 0 : index
      %c0_19 = arith.constant 0 : index
      %18 = vector.load %arg7[%c0_17, %c0_18, %c0_19] : memref<2x32x128xf32, #tpu.memory_space<vmem>>, vector<2x32x128xf32>
      tpu.vector_store %arg7[%c0_17, %c0_18, %c0_19], %17 {strides = array<i32>} : memref<2x32x128xf32, #tpu.memory_space<vmem>>, vector<2x32x128xf32>,
    }
    %c2_i32_2 = arith.constant 2 : i32
    %c0_i32_3 = arith.constant 0 : i32
    %4 = arith.cmpi eq, %arg1, %c0_i32_3 : i32
    %5 = arith.extui %4 : i1 to i32
    %c0_i32_4 = arith.constant 0 : i32
    %6 = arith.cmpi ne, %5, %c0_i32_4 : i32
    scf.if %6 {
      %c0 = arith.constant 0 : index
      %c0_5 = arith.constant 0 : index
      %c0_6 = arith.constant 0 : index
      %7 = vector.load %arg6[%c0, %c0_5, %c0_6] : memref<2x32x128xf32, #tpu.memory_space<vmem>>, vector<2x32x128xf32>
      %cst = arith.constant dense<0.000000e+00> : vector<2x32xf32>
      %8 = vector.multi_reduction <add>, %7, %cst [2] : vector<2x32x128xf32> to vector<2x32xf32>
      %cst_7 = arith.constant 3.906250e-03 : f32
      %9 = vector.broadcast %cst_7 : f32 to vector<2x32xf32>
      %10 = arith.mulf %8, %9 : vector<2x32xf32>
      %c0_8 = arith.constant 0 : index
      %c0_9 = arith.constant 0 : index
      %c0_10 = arith.constant 0 : index
      %11 = vector.load %arg7[%c0_8, %c0_9, %c0_10] : memref<2x32x128xf32, #tpu.memory_space<vmem>>, vector<2x32x128xf32>
      %cst_11 = arith.constant dense<0xFF800000> : vector<2x32xf32>
      %12 = vector.multi_reduction <maximumf>, %11, %cst_11 [2] : vector<2x32x128xf32> to vector<2x32xf32>
      %c0_12 = arith.constant 0 : index
      %c0_13 = arith.constant 0 : index
      %13 = vector.load %arg3[%c0_12, %c0_13] : memref<32x128xf32, #tpu.memory_space<vmem>>, vector<32x128xf32>
      %cst_14 = arith.constant dense<0.000000e+00> : vector<2x128xf32>
      %14 = tpu.matmul %10, %13, %cst_14 {dimension_numbers = #tpu.dot_dimension_numbers<[1], [0], [0], [1], [0, 0, 1, 1], [], []>} : vector<2x32xf32>, vector<32x128xf32>, vector<2x128xf32> -> vector<2x128xf32>
      %cst_15 = arith.constant 0.000000e+00 : f32
      %15 = vector.broadcast %cst_15 : f32 to vector<2x128xf32>
      %16 = arith.maximumf %14, %15 : vector<2x128xf32>
      %cst_16 = arith.constant dense<0.000000e+00> : vector<2x128xf32>
      %17 = tpu.matmul %12, %13, %cst_16 {dimension_numbers = #tpu.dot_dimension_numbers<[1], [0], [0], [1], [0, 0, 1, 1], [], []>} : vector<2x32xf32>, vector<32x128xf32>, vector<2x128xf32> -> vector<2x128xf32>
      %cst_17 = arith.constant 0.000000e+00 : f32
      %18 = vector.broadcast %cst_17 : f32 to vector<2x128xf32>
      %19 = arith.maximumf %17, %18 : vector<2x128xf32>
      %20 = arith.addf %16, %19 : vector<2x128xf32>
      %c0_18 = arith.constant 0 : index
      %c0_19 = arith.constant 0 : index
      %21 = vector.load %arg4[%c0_18, %c0_19] : memref<128x32xf32, #tpu.memory_space<vmem>>, vector<128x32xf32>
      %cst_20 = arith.constant dense<0.000000e+00> : vector<2x32xf32>
      %22 = tpu.matmul %20, %21, %cst_20 {dimension_numbers = #tpu.dot_dimension_numbers<[1], [0], [0], [1], [0, 0, 1, 1], [], []>} : vector<2x128xf32>, vector<128x32xf32>, vector<2x32xf32> -> vector<2x32xf32>
      %23 = arith.negf %22 : vector<2x32xf32>
      %24 = math.exp %23 : vector<2x32xf32>
      %cst_21 = arith.constant 1.000000e+00 : f32
      %25 = vector.broadcast %cst_21 : f32 to vector<2x32xf32>
      %26 = arith.addf %25, %24 : vector<2x32xf32>
      %27 = arith.divf %25, %26 : vector<2x32xf32>
      %c0_22 = arith.constant 0 : index
      %c0_23 = arith.constant 0 : index
      %28 = vector.load %arg5[%c0_22, %c0_23] : memref<2x32xf32, #tpu.memory_space<vmem>>, vector<2x32xf32>
      tpu.vector_store %arg5[%c0_22, %c0_23], %27 {strides = array<i32>} : memref<2x32xf32, #tpu.memory_space<vmem>>, vector<2x32xf32>,
    } else {
    }
    return
  }
  func.func @transform_0(%arg0: i32, %arg1: i32) -> (i32, i32, i32) {
    %c0_i32 = arith.constant 0 : i32
    %c0_i32_0 = arith.constant 0 : i32
    return %arg0, %c0_i32, %arg1 : i32, i32, i32
  }
  func.func @transform_1(%arg0: i32, %arg1: i32) -> (i32, i32) {
    %c0_i32 = arith.constant 0 : i32
    %c0_i32_0 = arith.constant 0 : i32
    %c0_i32_1 = arith.constant 0 : i32
    return %c0_i32, %c0_i32_0 : i32, i32
  }
  func.func @transform_2(%arg0: i32, %arg1: i32) -> (i32, i32) {
    %c0_i32 = arith.constant 0 : i32
    %c0_i32_0 = arith.constant 0 : i32
    %c0_i32_1 = arith.constant 0 : i32
    return %c0_i32, %c0_i32_0 : i32, i32
  }
  func.func @transform_3(%arg0: i32, %arg1: i32) -> (i32, i32) {
    %c0_i32 = arith.constant 0 : i32
    %c0_i32_0 = arith.constant 0 : i32
    return %arg0, %c0_i32 : i32, i32
  }
}

</mosaic_0001>

<bundles_post_ra>
// kernel: tpu_custom_call.1
= control target key start
LH: loop header
LB: loop body
LE: loop exit
PB: predicated region body
PF: predicated region fallthrough
CT: control target
= control target key end

     0   :  { %8 = vsyncpa [#allocation5], 0  ;;  %v705_v0 = vmov 0.0   ;;  %v706_v1 = vmov -inf   ;;  %s738_s12 = smov 0   ;;  %s864_s0 = inlined_call_operand.vmem [shape: f32[2,32,256], index: 0, kind: input, shape index: {}]   ;;  %s865_s1 = inlined_call_operand.vmem [shape: f32[32,128], index: 1, kind: input, shape index: {}]   ;;  %s866_s2 = inlined_call_operand.vmem [shape: f32[128,32], index: 2, kind: input, shape index: {}]   ;;  %s867_s3 = inlined_call_operand.hbm [shape: f32[2,32], index: 3, kind: output, shape index: {}]  }
   0x1   :  { %19 = vst [vmem:[#allocation2] sm:$0xff] %v705_v0  ;;  %20 = vst [vmem:[#allocation2 + $0x8] sm:$0xff] %v705_v0 }
   0x2   :  { %21 = vst [vmem:[#allocation2 + $0x10] sm:$0xff] %v705_v0  ;;  %22 = vst [vmem:[#allocation2 + $0x18] sm:$0xff] %v705_v0 }
   0x3   :  { %23 = vst [vmem:[#allocation2 + $0x20] sm:$0xff] %v705_v0  ;;  %24 = vst [vmem:[#allocation2 + $0x28] sm:$0xff] %v705_v0 }
   0x4   :  { %25 = vst [vmem:[#allocation2 + $0x30] sm:$0xff] %v705_v0  ;;  %26 = vst [vmem:[#allocation2 + $0x38] sm:$0xff] %v705_v0 }
   0x5   :  { %27 = vst [vmem:[#allocation3] sm:$0xff] %v706_v1  ;;  %28 = vst [vmem:[#allocation3 + $0x8] sm:$0xff] %v706_v1 }
   0x6   :  { %29 = vst [vmem:[#allocation3 + $0x10] sm:$0xff] %v706_v1  ;;  %30 = vst [vmem:[#allocation3 + $0x18] sm:$0xff] %v706_v1 }
   0x7   :  { %31 = vst [vmem:[#allocation3 + $0x20] sm:$0xff] %v706_v1  ;;  %32 = vst [vmem:[#allocation3 + $0x28] sm:$0xff] %v706_v1 }
   0x8   :  { %33 = vst [vmem:[#allocation3 + $0x30] sm:$0xff] %v706_v1  ;;  %34 = vst [vmem:[#allocation3 + $0x38] sm:$0xff] %v706_v1 }
   0x9 LB: > { %s531_s13 = sshll.u32 %s703_s12, 7  ;;  %v54_v2 = vld [vmem:[#allocation2] sm:$0xff]  ;;  %v55_v3 = vld [vmem:[#allocation2 + $0x8] sm:$0xff]  ;;  %v56_v4 = vld [vmem:[#allocation2 + $0x10] sm:$0xff]  ;;  %s40_s12 = sadd.s32 1, %s703_s12   ;;  %s703_s12 = sphi %s738_s12, %s40_s12  }
   0xa   : > { %s42_s14 = sshra.s32 %s531_s13, 7  ;;  %v57_v5 = vld [vmem:[#allocation2 + $0x18] sm:$0xff]  ;;  %v58_v6 = vld [vmem:[#allocation2 + $0x20] sm:$0xff]  ;;  %v59_v7 = vld [vmem:[#allocation2 + $0x28] sm:$0xff]  ;;  %p37_p0 = scmp.ge.s32.totalorder %s40_s12, 2  }
   0xb   : > { %s532_s15 = sshll.u32 %s42_s14, 3  ;;  %v60_v9 = vld [vmem:[#allocation2 + $0x30] sm:$0xff]  ;;  %v61_v10 = vld [vmem:[#allocation2 + $0x38] sm:$0xff]  ;;  %v161_v56 = vld [vmem:[%s865_s1] sm:$0xff] (%p37_p0)  ;;  %v707_v61 = vmov (%p37_p0), 0.0|0.0   ;;  %vm708_vm0 = vmmov (%p37_p0), 0  }
   0xc   : > { %v78_v8 = vld [vmem:[#allocation3] sm:$0xff]  ;;  %v79_v11 = vld [vmem:[#allocation3 + $0x8] sm:$0xff]  ;;  %s45_s18 = scalar_lea.vmem %s864_s0, %s532_s15  ;;  %620 = vmatprep.subr.bf16.mxu1 (%p37_p0), %v707_v61  ;;  %632 = vmatprep.subr.bf16.mxu0 (%p37_p0), %v707_v61  ;;  %v163_v62 = vld [vmem:[%s865_s1 + $0x10] sm:$0xff] (%p37_p0)  ;;  %vm184_vm1 = vcmask (%p37_p0), 130112   ;;  %vm191_vm2 = vcmask (%p37_p0), 195712   ;;  %vm198_vm3 = vcmask (%p37_p0), 261312  }
   0xd   : > { %v80_v12 = vld [vmem:[#allocation3 + $0x10] sm:$0xff]  ;;  %v81_v13 = vld [vmem:[#allocation3 + $0x18] sm:$0xff]  ;;  %v46_v18 = vld [vmem:[%s45_s18] sm:$0xff]  ;;  %571 = vmatprep.mubr.msk.f32.mxu1 (%p37_p0), %vm708_vm0, %v705_v0  ;;  %617 = vmatprep.mubr.msk.f32.mxu0 (%p37_p0), %vm708_vm0, %v705_v0  ;;  %vm219_vm4 = vcmask (%p37_p0), 1041409   ;;  %vm221_vm5 = vcmask (%p37_p0), 261120   ;;  %s709_s28 = smov (%p37_p0), [#allocation4]  }
   0xe   : > { %v82_v14 = vld [vmem:[#allocation3 + $0x20] sm:$0xff]  ;;  %v83_v15 = vld [vmem:[#allocation3 + $0x28] sm:$0xff]  ;;  %v47_v19 = vld [vmem:[%s45_s18 + $0x10] sm:$0xff]  ;;  %v62_v21 = vadd.f32 %v54_v2, %v46_v18  ;;  %v86_v27 = vmax.f32 %v78_v8, %v46_v18  ;;  %s516_s29 = sshll.u32 (%p37_p0), %s709_s28, 4  ;;  %vm508_vm6 = vcmask (%p37_p0), 254976   ;;  %s517_s29 = int_to_ptr.vmem [resolvable:$true] %s516_s29 }
   0xf   : > { %v84_v16 = vld [vmem:[#allocation3 + $0x30] sm:$0xff]  ;;  %v85_v17 = vld [vmem:[#allocation3 + $0x38] sm:$0xff]  ;;  %v48_v20 = vld [vmem:[%s45_s18 + $0x20] sm:$0xff]  ;;  %v63_v22 = vadd.f32 %v55_v3, %v47_v19  ;;  %v87_v33 = vmax.f32 %v79_v11, %v47_v19  ;;  %v173_v11 = vlaneseq (%p37_p0)  ;;  %p678_p2 = scmp.lt.s32.totalorder (%p37_p0), %s517_s29, %s517_s29 }
  0x10   : > { %v64_v23 = vadd.f32 %v56_v4, %v48_v20  ;;  %v49_v24 = vld [vmem:[%s45_s18 + $0x30] sm:$0xff]  ;;  %v50_v25 = vld [vmem:[%s45_s18 + $0x40] sm:$0xff]  ;;  %70 = vst [vmem:[#allocation2] sm:$0xff] %v62_v21  ;;  %94 = vst [vmem:[#allocation3] sm:$0xff] %v86_v27  ;;  %v88_v36 = vmax.f32 %v80_v12, %v48_v20 }
  0x11   : > { %v51_v26 = vld [vmem:[%s45_s18 + $0x50] sm:$0xff]  ;;  %v65_v28 = vadd.f32 %v57_v5, %v49_v24  ;;  %v66_v29 = vadd.f32 %v58_v6, %v50_v25  ;;  %v52_v31 = vld [vmem:[%s45_s18 + $0x60] sm:$0xff]  ;;  %71 = vst [vmem:[#allocation2 + $0x8] sm:$0xff] %v63_v22  ;;  %v89_v37 = vmax.f32 %v81_v13, %v49_v24  ;;  %95 = vst [vmem:[#allocation3 + $0x8] sm:$0xff] %v87_v33 }
  0x12   : > { %v67_v30 = vadd.f32 %v59_v7, %v51_v26  ;;  %v53_v32 = vld [vmem:[%s45_s18 + $0x70] sm:$0xff]  ;;  %72 = vst [vmem:[#allocation2 + $0x10] sm:$0xff] %v64_v23  ;;  %v68_v34 = vadd.f32 %v60_v9, %v52_v31  ;;  %v90_v38 = vmax.f32 %v82_v14, %v50_v25  ;;  %v91_v39 = vmax.f32 %v83_v15, %v51_v26  ;;  %v162_v57 = vld [vmem:[%s865_s1 + $0x8] sm:$0xff] (%p37_p0)  ;;  %v164_v63 = vld [vmem:[%s865_s1 + $0x18] sm:$0xff] (%p37_p0) }
  0x13   : > { %v69_v35 = vadd.f32 %v61_v10, %v53_v32  ;;  %73 = vst [vmem:[#allocation2 + $0x18] sm:$0xff] %v65_v28  ;;  %74 = vst [vmem:[#allocation2 + $0x20] sm:$0xff] %v66_v29  ;;  %v92_v40 = vmax.f32 %v84_v16, %v52_v31  ;;  %v93_v41 = vmax.f32 %v85_v17, %v53_v32  ;;  %v416_v2 = vld [vmem:[%s866_s2] sm:$0xff] (%p37_p0)  ;;  %v417_v3 = vld [vmem:[%s866_s2 + $0x8] sm:$0xff] (%p37_p0)  ;;  %v174_v14 = vand.u32 (%p37_p0), 127, %v173_v11 }
  0x14   : > { %75 = vst [vmem:[#allocation2 + $0x28] sm:$0xff] %v67_v30  ;;  %76 = vst [vmem:[#allocation2 + $0x30] sm:$0xff] %v68_v34  ;;  %v756_v58 = vpack.c.bf16 (%p37_p0), %v162_v57, %v161_v56  ;;  %v768_v1 = vpack.c.bf16 (%p37_p0), %v164_v63, %v163_v62  ;;  %v418_v4 = vld [vmem:[%s866_s2 + $0x10] sm:$0xff] (%p37_p0)  ;;  %v633_v5 = vpack.c.bf16 (%p37_p0), %v417_v3, %v416_v2  ;;  %v419_v6 = vld [vmem:[%s866_s2 + $0x18] sm:$0xff] (%p37_p0)  ;;  %v176_v16 = vshrl.u32 (%p37_p0), %v173_v11, 7 }
  0x15   : > { %77 = vst [vmem:[#allocation2 + $0x38] sm:$0xff] %v69_v35  ;;  %96 = vst [vmem:[#allocation3 + $0x10] sm:$0xff] %v88_v36  ;;  %v636_v7 = vpack.c.bf16 (%p37_p0), %v419_v6, %v418_v4  ;;  %v420_v8 = vld [vmem:[%s866_s2 + $0x20] sm:$0xff] (%p37_p0)  ;;  %v421_v9 = vld [vmem:[%s866_s2 + $0x28] sm:$0xff] (%p37_p0)  ;;  %v179_v15 = vadd.s32 (%p37_p0), 4294967288, %v174_v14  ;;  %v186_v19 = vadd.s32 (%p37_p0), 4294967280, %v174_v14 }
  0x16   : > { %97 = vst [vmem:[#allocation3 + $0x18] sm:$0xff] %v89_v37  ;;  %98 = vst [vmem:[#allocation3 + $0x20] sm:$0xff] %v90_v38  ;;  %622 = vmatpush3.bf16.msra.mxu1 (%p37_p0), %v756_v58  ;;  %634 = vmatpush3.bf16.msra.mxu0 (%p37_p0), %v633_v5  ;;  %v639_v10 = vpack.c.bf16 (%p37_p0), %v421_v9, %v420_v8  ;;  %v193_v23 = vadd.s32 (%p37_p0), 4294967272, %v174_v14  ;;  %v177_v24 = vsub.s32 (%p37_p0), %v174_v14, %v176_v16 }
  0x17   : > { %99 = vst [vmem:[#allocation3 + $0x28] sm:$0xff] %v91_v39  ;;  %100 = vst [vmem:[#allocation3 + $0x30] sm:$0xff] %v92_v40  ;;  %39 = sbr.rel (!%p37_p0) target bundleno = 9 (0x9), region = 48  ;;  %v105_v43 = vld [vmem:[#allocation2] sm:$0xff] (%p37_p0)  ;;  %623 = vmatprep.subr.bf16.mxu1 (%p37_p0), %v707_v61  ;;  %635 = vmatprep.subr.bf16.mxu0 (%p37_p0), %v707_v61  ;;  %v182_v20 = vsub.s32 (%p37_p0), %v179_v15, %v176_v16  ;;  %v189_v25 = vsub.s32 (%p37_p0), %v186_v19, %v176_v16  ;;  %v427_v19 = vld [vmem:[%s866_s2 + $0x58] sm:$0xff] (%p37_p0) }
  0x18   : > { %101 = vst [vmem:[#allocation3 + $0x38] sm:$0xff] %v93_v41  ;;  %113 = vadd.xlane.f32.xlu0 (%p37_p0), %v105_v43  ;;  %v106_v45 = vld [vmem:[#allocation2 + $0x8] sm:$0xff] (%p37_p0)  ;;  %v137_v51 = vld [vmem:[#allocation3] sm:$0xff] (%p37_p0)  ;;  %v196_v34 = vsub.s32 (%p37_p0), %v193_v23, %v176_v16 }
  0x19   :  { %v107_v47 = vld [vmem:[#allocation2 + $0x10] sm:$0xff] (%p37_p0)  ;;  %v138_v50 = vld [vmem:[#allocation3 + $0x8] sm:$0xff] (%p37_p0)  ;;  %v424_v15 = vld [vmem:[%s866_s2 + $0x40] sm:$0xff] (%p37_p0) }
  0x1a   :  { %v109_v42 = vld [vmem:[#allocation2 + $0x20] sm:$0xff] (%p37_p0)  ;;  %v108_v49 = vld [vmem:[#allocation2 + $0x18] sm:$0xff] (%p37_p0)  ;;  %625 = vmatpush3.bf16.msra.mxu1 (%p37_p0), %v768_v1  ;;  %637 = vmatpush3.bf16.msra.mxu0 (%p37_p0), %v636_v7  ;;  %v425_v16 = vld [vmem:[%s866_s2 + $0x48] sm:$0xff] (%p37_p0) }
  0x1b   :  { %121 = vadd.xlane.f32.xlu1 (%p37_p0), %v109_v42  ;;  %v110_v44 = vld [vmem:[#allocation2 + $0x28] sm:$0xff] (%p37_p0)  ;;  %v111_v46 = vld [vmem:[#allocation2 + $0x30] sm:$0xff] (%p37_p0)  ;;  %626 = vmatprep.subr.bf16.mxu1 (%p37_p0), %v707_v61 }
  0x1c   :  { %115 = vadd.xlane.f32.xlu0 (%p37_p0), %v106_v45  ;;  %v112_v48 = vld [vmem:[#allocation2 + $0x38] sm:$0xff] (%p37_p0)  ;;  %v139_v55 = vld [vmem:[#allocation3 + $0x10] sm:$0xff] (%p37_p0)  ;;  %638 = vmatprep.subr.bf16.mxu0 (%p37_p0), %v707_v61 }
  0x1d   :  { %v141_v53 = vld [vmem:[#allocation3 + $0x20] sm:$0xff] (%p37_p0)  ;;  %v140_v60 = vld [vmem:[#allocation3 + $0x18] sm:$0xff] (%p37_p0) }
  0x1e   :  { %v142_v52 = vld [vmem:[#allocation3 + $0x28] sm:$0xff]  ;;  %v143_v54 = vld [vmem:[#allocation3 + $0x30] sm:$0xff]  ;;  %640 = vmatpush3.bf16.msra.mxu0 %v639_v10 }
  0x1f   :  { %123 = vadd.xlane.f32.xlu1 %v110_v44  ;;  %v144_v59 = vld [vmem:[#allocation3 + $0x38] sm:$0xff]  ;;  %641 = vmatprep.subr.bf16.mxu0 %v707_v61 }
  0x20   :  { %117 = vadd.xlane.f32.xlu0 %v107_v47 }
  0x23   :  { %125 = vadd.xlane.f32.xlu1 %v111_v46 }
  0x24   :  { %119 = vadd.xlane.f32.xlu0 %v108_v49 }
  0x27   :  { %127 = vadd.xlane.f32.xlu1 %v112_v48 }
  0x28   :  { %145 = vmax.xlane.f32.xlu0 %v137_v51 }
  0x2b   :  { %147 = vmax.xlane.f32.xlu1 %v138_v50 }
  0x2c   :  { %153 = vmax.xlane.f32.xlu0 %v141_v53 }
  0x2f   :  { %155 = vmax.xlane.f32.xlu1 %v142_v52 }
  0x30   :  { %149 = vmax.xlane.f32.xlu0 %v139_v55 }
  0x33   :  { %157 = vmax.xlane.f32.xlu1 %v143_v54 }
  0x34   :  { %151 = vmax.xlane.f32.xlu0 %v140_v60 }
  0x37   :  { %159 = vmax.xlane.f32.xlu1 %v144_v59 }
  0xa5   :  { %v114_v13 = vpop.xlane.xlu0 %113 }
  0xa6   :  { %v129_v29 = vmul.f32 0.00390625, %v114_v13  ;;  %v423_v13 = vld [vmem:[%s866_s2 + $0x38] sm:$0xff] }
  0xa8   :  { %v122_v12 = vpop.xlane.xlu1 %121  ;;  %v178_v40 = vrot.slane %v129_v29, %v177_v24 }
  0xa9   :  { %v116_v18 = vpop.xlane.xlu0 %115  ;;  %v133_v28 = vmul.f32 0.00390625, %v122_v12  ;;  %v422_v12 = vld [vmem:[%s866_s2 + $0x30] sm:$0xff] }
  0xaa   :  { %v130_v22 = vmul.f32 0.00390625, %v116_v18  ;;  %v642_v14 = vpack.c.bf16 %v423_v13, %v422_v12  ;;  %v645_v18 = vpack.c.bf16 %v425_v16, %v424_v15 }
  0xab   :  { %v203_v39 = vrot.slane %v133_v28, %v177_v24 }
  0xac   :  { %v124_v17 = vpop.xlane.xlu1 %123  ;;  %v183_v33 = vrot.slane %v130_v22, %v182_v20  ;;  %643 = vmatpush3.bf16.msra.mxu0 %v642_v14  ;;  %v429_v22 = vld [vmem:[%s866_s2 + $0x68] sm:$0xff] }
  0xad   :  { %v134_v21 = vmul.f32 0.00390625, %v124_v17  ;;  %v118_v27 = vpop.xlane.xlu0 %117  ;;  %644 = vmatprep.subr.bf16.mxu0 %v707_v61  ;;  %v426_v17 = vld [vmem:[%s866_s2 + $0x50] sm:$0xff] }
  0xae   :  { %v131_v31 = vmul.f32 0.00390625, %v118_v27  ;;  %v185_v44 = vsel %vm184_vm1, %v183_v33, %v178_v40 }
  0xaf   :  { %v207_v32 = vrot.slane %v134_v21, %v182_v20  ;;  %v428_v21 = vld [vmem:[%s866_s2 + $0x60] sm:$0xff] }
  0xb0   :  { %v126_v26 = vpop.xlane.xlu1 %125  ;;  %v190_v36 = vrot.slane %v131_v31, %v189_v25  ;;  %646 = vmatpush3.bf16.msra.mxu0 %v645_v18  ;;  %v651_v23 = vpack.c.bf16 %v429_v22, %v428_v21 }
  0xb1   :  { %v135_v30 = vmul.f32 0.00390625, %v126_v26  ;;  %v120_v38 = vpop.xlane.xlu0 %119  ;;  %v208_v43 = vsel %vm184_vm1, %v207_v32, %v203_v39  ;;  %647 = vmatprep.subr.bf16.mxu0 %v707_v61 }
  0xb2   :  { %v132_v42 = vmul.f32 0.00390625, %v120_v38  ;;  %v192_v48 = vsel %vm191_vm2, %v190_v36, %v185_v44 }
  0xb3   :  { %v212_v35 = vrot.slane %v135_v30, %v189_v25 }
  0xb4   :  { %v128_v37 = vpop.xlane.xlu1 %127  ;;  %v197_v46 = vrot.slane %v132_v42, %v196_v34 }
  0xb5   :  { %v136_v41 = vmul.f32 0.00390625, %v128_v37  ;;  %v213_v47 = vsel %vm191_vm2, %v212_v35, %v208_v43  ;;  %v146_v50 = vpop.xlane.xlu0 %145 }
  0xb6   :  { %v199_v51 = vsel %vm198_vm3, %v197_v46, %v192_v48  ;;  %v306_v60 = vrot.slane %v146_v50, %v177_v24 }
  0xb7   :  { %v217_v45 = vrot.slane %v136_v41, %v196_v34 }
  0xb8   :  { %v148_v49 = vpop.xlane.xlu1 %147 }
  0xb9   :  { %v218_v52 = vsel %vm198_vm3, %v217_v45, %v213_v47  ;;  %v154_v55 = vpop.xlane.xlu0 %153  ;;  %v310_v59 = vrot.slane %v148_v49, %v182_v20 }
  0xba   :  { %v220_v53 = vsel %vm219_vm4, %v218_v52, %v199_v51  ;;  %v325_v63 = vrot.slane %v154_v55, %v177_v24  ;;  %v430_v24 = vld [vmem:[%s866_s2 + $0x70] sm:$0xff] }
  0xbb   :  { %572 = vmatmul.mubr.msk.f32.vlgmr.msra.gmra.mrb[0].mxu1 %vm221_vm5, %v220_v53  ;;  %v311_v6 = vsel %vm184_vm1, %v310_v59, %v306_v60 }
  0xbc   :  { %v156_v54 = vpop.xlane.xlu1 %155  ;;  %628 = vmatpush3.bf16.msra.mxu1 %v756_v58  ;;  %582 = vmatprep.mubr.msk.f32.mxu1 %vm708_vm0, %v705_v0 }
  0xbd   :  { %629 = vmatprep.subr.bf16.mxu1 %v707_v61  ;;  %v150_v57 = vpop.xlane.xlu0 %149  ;;  %v329_v62 = vrot.slane %v156_v54, %v182_v20  ;;  %v648_v20 = vpack.c.bf16 %v427_v19, %v426_v17 }
  0xbe   :  { %v315_v3 = vrot.slane %v150_v57, %v189_v25 }
  0xbf   :  { %v330_v58 = vsel %vm184_vm1, %v329_v62, %v325_v63  ;;  %649 = vmatpush3.bf16.msra.mxu0 %v648_v20 }
  0xc0   :  { %v158_v56 = vpop.xlane.xlu1 %157  ;;  %631 = vmatpush3.bf16.msra.mxu1 %v768_v1  ;;  %v316_v9 = vsel %vm191_vm2, %v315_v3, %v311_v6  ;;  %650 = vmatprep.subr.bf16.mxu0 %v707_v61 }
  0xc1   :  { %v334_v2 = vrot.slane %v158_v56, %v189_v25  ;;  %v152_v5 = vpop.xlane.xlu0 %151  ;;  %v431_v25 = vld [vmem:[%s866_s2 + $0x78] sm:$0xff]  ;;  %s673_s2 = scalar_lea.vmem %s517_s29, 32 }
  0xc2   :  { %v320_v0 = vrot.slane %v152_v5, %v196_v34  ;;  %v654_v26 = vpack.c.bf16 %v431_v25, %v430_v24  ;;  %p674_p1 = scmp.ne.s32.totalorder %s517_s29, %s673_s2  ;;  %p679_p3 = scmp.lt.s32.totalorder %s673_s2, %s673_s2 }
  0xc3   :  { %v335_v8 = vsel %vm191_vm2, %v334_v2, %v330_v58  ;;  %652 = vmatpush3.bf16.msra.mxu0 %v651_v23 }
  0xc4   :  { %v160_v4 = vpop.xlane.xlu1 %159  ;;  %v321_v10 = vsel %vm198_vm3, %v320_v0, %v316_v9  ;;  %653 = vmatprep.subr.bf16.mxu0 %v707_v61  ;;  %p680_p4 = por %p679_p3, %p678_p2 }
  0xc5   :  { %v339_v7 = vrot.slane %v160_v4, %v196_v34 }
  0xc6   :  { %p681_p5 = pnand %p680_p4, %p674_p1 }
  0xc7   :  { %v340_v1 = vsel %vm198_vm3, %v339_v7, %v335_v8  ;;  %655 = vmatpush3.bf16.msra.mxu0 %v654_v26 }
  0xc8   :  { %v341_v11 = vsel %vm219_vm4, %v340_v1, %v321_v10 }
  0xc9   :  { %583 = vmatmul.mubr.msk.f32.vlgmr.msra.gmra.mrb[2].mxu1 %vm221_vm5, %v341_v11 }
 0x18e   :  { %v290_v27 = vpop.f32.mrb[0].mxu1 }
 0x18f   :  { %v573_v28 = vpop.f32.mrb[1].mxu1  ;;  %v294_v30 = vmax.f32 %v290_v27, 0.0 }
 0x19c   :  { %v410_v29 = vpop.f32.mrb[2].mxu1 }
 0x19d   :  { %v414_v31 = vmax.f32 %v410_v29, 0.0  ;;  %v584_v32 = vpop.f32.mrb[3].mxu1 }
 0x19f   :  { %v415_v33 = vadd.f32 %v414_v31, %v294_v30 }
 0x1a1   :  { %618 = vmatmul.mubr.f32.vlgmr.msra.gmra.mrb[0].mxu0 %v415_v33 }
 0x274   :  { %v498_v34 = vpop.f32.mrb[0].mxu0 }
 0x275   :  { %v535_v61 = vmul.f32 -1.442695, %v498_v34  ;;  %v619_v35 = vpop.f32.mrb[1].mxu0 }
 0x277   :  { %669 = vpow2.f32 %v535_v61 }
 0x281   :  { %v670_v36 = vpop.eup %669 }
 0x282   :  { %v505_v37 = vadd.f32 1.0, %v670_v36 }
 0x284   :  { %671 = vrcp.f32 %v505_v37 }
 0x28e   :  { %v672_v38 = vpop.eup %671 }
 0x28f   :  { %509 = vst.msk [vmem:[#allocation4] sm:$0x3] %vm508_vm6, %v672_v38 }
 0x290   :  { %684 = shalt.err (!%p681_p5)
}
 0x291   :  { %s685_s5 = scalar_lea.hbm %s867_s3, 32 }
 0x292   :  { %p686_p6 = scmp.ne.s32.totalorder %s867_s3, %s685_s5  ;;  %p689_p7 = scmp.lt.u32.totalorder %s685_s5, %s867_s3 }
 0x294   :  { %p691_p8 = pnand %p689_p7, %p686_p6 }
 0x296   :  { %694 = shalt.err (!%p691_p8)
}
 0x297   :  { %519 = dma.vmem_to_hbm [thread:$0]  %s517_s29, 32, %s867_s3, [#allocation5]  }
 0x298   :  { %699 = dma.done.wait [#allocation5], 32  }
 0x299   :  { %700 = vsyncadd [#allocation5], 4294967264 }
 0x29a   :  { %523 = vsyncpa [#allocation5], 1 }

</bundles_post_ra>
